<compile_context>
chip_gen: v7x
topology: tpu7x:2x2x1
jax: 0.10.0
libtpu: 0.0.40
codegen_flags: <defaults>
</compile_context>

<pallas_src>
import functools

import numpy as np
import jax
import jax.numpy as jnp
from jax.experimental import pallas as pl
from jax.experimental.pallas import tpu as pltpu


def _modulated_linear_kernel(smod_ref, w0_ref, x_ref, o_ref, w_scratch,
                             *, demodulation, matmul_dtype):
    """One grid step = (batch b, L_outer tile lo, L_inner tile li).

    smod_ref : (1, C_in)     f32   scale*style for batch b (style-FC hoisted)
    w0_ref   : (C_out, C_in) f32   base weight (grid-invariant, DMA'd once)
    x_ref    : (C_in, Lt)    native x dtype (cast in-kernel)
    o_ref    : (C_out, Lt)   output dtype
    w_scratch: (C_out, C_in) matmul dtype  per-(b, lo) modulated weight,
                                           reused across inner L tiles.
    """
    li = pl.program_id(2)

    # Build the modulated (+ optionally demodulated) weight once per (b, lo)
    # in f32 (VPU/XLU/EUP work, off the MXU critical path), then cast once.
    # `scale` is already folded into smod in the wrapper.
    @pl.when(li == 0)
    def _():
        w = w0_ref[...] * smod_ref[...]                               # (C_out, C_in)
        if demodulation:
            demod = jax.lax.rsqrt(jnp.sum(w * w, axis=1, keepdims=True) + 1e-8)
            w = w * demod
        w_scratch[...] = w.astype(w_scratch.dtype)

    # Cast the streamed x tile in-kernel (saves a whole HBM pass vs. wrapper
    # cast); grouped 1x1 conv1d == per-batch matmul, f32 accumulation on MXU.
    x = x_ref[...].astype(matmul_dtype)
    o_ref[...] = jnp.dot(w_scratch[...], x,
                         preferred_element_type=jnp.float32).astype(o_ref.dtype)


def _vmem_budget_bytes():
    """Conservative per-kernel VMEM budget: 75% of physical capacity, with a
    64 MiB (v7x-sized) fallback if the hardware query is unavailable."""
    try:
        cap = int(pltpu.get_tpu_info().vmem_capacity_bytes)
    except Exception:
        cap = 64 << 20
    return int(cap * 0.75)


def _pick_l_tile(img_size, c_in, c_out, x_bytes, out_bytes, mm_bytes, budget):
    """Largest lane-aligned img_size tile whose double-buffered x/out blocks
    (plus weight buffers/scratch) fit the VMEM budget."""
    if img_size <= 128:
        return img_size
    fixed = (2 * c_out * c_in * 4          # w0 buffers (f32, conservative: 2)
             + c_out * c_in * mm_bytes     # modulated-weight scratch
             + 2 * c_in * 4)               # smod (double-buffered, tiny)
    per_col = 2 * c_in * x_bytes + 2 * c_out * out_bytes   # dbl-buffered x & out
    avail = max(budget - fixed, per_col * 128)
    lt = int(avail // per_col)
    lt = max(128, min(lt, img_size, 2048))
    if lt >= img_size:
        return img_size
    return (lt // 128) * 128


def modulated_linear(x, style, w0, fc_w=None, *, demodulation=True,
                     matmul_dtype=jnp.bfloat16, out_dtype=None, l_tile=None,
                     single_buffer_w0=True):
    """x: (B, img_size, in_channels), style: (B, style_size),
    w0: (1, out_channels, in_channels, 1), fc_w: (in_channels, style_size) or
    None (module's style_size == in_channels pass-through branch)."""
    B, img_size, c_in = x.shape
    c_out = w0.shape[1]
    if matmul_dtype is None:
        matmul_dtype = x.dtype
    if out_dtype is None:
        out_dtype = x.dtype
    scale = float(1.0 / np.sqrt(c_in))               # ModulatedLinear.scale

    # --- Modulation FC hoisted out of the kernel: one well-shaped matmul in
    # XLA instead of a degenerate 1-row MXU matmul per grid step. `scale` is
    # folded in here (commutes through the demod normalization).
    s_dim = style.shape[1]
    if s_dim != c_in:
        assert fc_w is not None, "style_size != in_channels requires the FC weight"
        fc_gain = float(1.0 / np.sqrt(s_dim))        # FullyConnectedLayer.weight_gain
        smod = jnp.dot(style.astype(jnp.float32),
                       (fc_w.astype(jnp.float32) * fc_gain).T)        # (B, C_in)
    else:
        smod = style.astype(jnp.float32)             # pass-through branch
    smod = (smod * scale).reshape(B, 1, c_in)

    w0_2d = w0.reshape(c_out, c_in).astype(jnp.float32)     # (1,O,C,1) -> (O,C)

    # torch: input.reshape(1, B*C_in, img_size) (row-major reinterpret per
    # batch). NOTE: kept in x's native dtype -- no extra HBM conversion pass.
    x_g = x.reshape(B, c_in, img_size)

    # --- img_size (L) tiling from an explicit VMEM budget. ---
    budget = _vmem_budget_bytes()
    x_bytes = int(np.dtype(x.dtype).itemsize)
    out_bytes = int(np.dtype(out_dtype).itemsize)
    mm_bytes = int(np.dtype(matmul_dtype).itemsize)
    if l_tile is None:
        lt = _pick_l_tile(img_size, c_in, c_out, x_bytes, out_bytes, mm_bytes,
                          budget)
    else:
        lt = min(int(l_tile), img_size)
        if lt < img_size:
            assert lt % 128 == 0, "l_tile must be a multiple of 128 (lane width)"
    n_l = pl.cdiv(img_size, lt)

    # Megacore (v7x) with tiny batch: also shard the L axis across TensorCores
    # by splitting it into (L_outer "parallel", L_inner "arbitrary"); the
    # modulated weight is rebuilt at L_inner == 0, so this stays correct.
    n_outer = 1
    if B < 2 and n_l >= 2 and n_l % 2 == 0:
        n_outer = 2
    n_inner = n_l // n_outer

    kernel = functools.partial(_modulated_linear_kernel,
                               demodulation=demodulation,
                               matmul_dtype=matmul_dtype)

    def _make_call(w0_buffers):
        w0_kwargs = {}
        if w0_buffers == 1:
            # Grid-invariant base weight: single-buffer to reclaim VMEM.
            w0_kwargs["pipeline_mode"] = pl.Buffered(1)
        grid_spec = pltpu.PrefetchScalarGridSpec(
            num_scalar_prefetch=0,
            grid=(B, n_outer, n_inner),
            in_specs=[
                # Leading batch dims squeezed (None) -> kernel sees 2-D refs.
                pl.BlockSpec((None, 1, c_in), lambda b, lo, li: (b, 0, 0)),   # smod
                # w0 block index is constant -> DMA'd once.
                pl.BlockSpec((c_out, c_in), lambda b, lo, li: (0, 0),
                             **w0_kwargs),                                    # base W
                pl.BlockSpec((None, c_in, lt),
                             lambda b, lo, li: (b, 0, lo * n_inner + li)),    # x
            ],
            out_specs=pl.BlockSpec((None, c_out, lt),
                                   lambda b, lo, li: (b, 0, lo * n_inner + li)),
            scratch_shapes=[pltpu.VMEM((c_out, c_in), matmul_dtype)],
        )
        return pl.pallas_call(
            kernel,
            out_shape=jax.ShapeDtypeStruct((B, c_out, img_size), out_dtype),
            grid_spec=grid_spec,
            compiler_params=pltpu.CompilerParams(
                # (B, L_outer) independent -> "parallel" (v7x dual-TC sharding);
                # L_inner reuses the per-(b, lo) weight scratch -> "arbitrary".
                dimension_semantics=("parallel", "parallel", "arbitrary"),
                vmem_limit_bytes=int(budget),
            ),
        )

    if single_buffer_w0:
        try:
            out = _make_call(1)(smod, w0_2d, x_g)
        except Exception:
            # Compile-robust fallback: default double-buffering of w0 (costs
            # one extra (C_out,C_in) f32 copy of VMEM, already in the budget).
            out = _make_call(2)(smod, w0_2d, x_g)
    else:
        out = _make_call(2)(smod, w0_2d, x_g)

    # torch: out.view(B, img_size, C_out) from (1, B*C_out, img_size)
    return out.reshape(B, img_size, c_out)


def _torch_semantics_ref(x, style, w0, fc_w=None, demodulation=True,
                         matmul_dtype=None):
    """Pure-JAX transcription of the torch forward, for verification."""
    B, img_size, c_in = x.shape
    c_out = w0.shape[1]
    scale = float(1.0 / np.sqrt(c_in))
    s_dim = style.shape[1]
    if s_dim != c_in:
        fc_gain = float(1.0 / np.sqrt(s_dim))
        style = style @ (fc_w * fc_gain).T                     # FC, no bias
    style = style.reshape(B, 1, c_in, 1)
    weight = scale * w0 * style                                # (B, O, C, 1)
    if demodulation:
        demod = jax.lax.rsqrt(jnp.sum(weight ** 2, axis=2) + 1e-8)   # (B, O, 1)
        weight = weight * demod.reshape(B, c_out, 1, 1)
    weight = weight.reshape(B, c_out, c_in)
    xg = x.reshape(B, c_in, img_size)                          # torch reshape
    if matmul_dtype is not None:
        weight = weight.astype(matmul_dtype)
        xg = xg.astype(matmul_dtype)
    out = jnp.einsum("boc,bcl->bol", weight, xg,
                     preferred_element_type=jnp.float32).astype(x.dtype)
    return out.reshape(B, img_size, c_out)                     # torch view


if __name__ == "__main__":
    # Small but hardware-friendly shapes: img_size is a multiple of 128 (lane-
    # dense output stores), C_out a multiple of 8 (sublanes).
    B, in_channels, out_channels, style_size, img_size = 2, 8, 16, 4, 256

    key = jax.random.PRNGKey(0)
    k_w, k_fc, k_x, k_s = jax.random.split(key, 4)

    w0 = jax.random.normal(k_w, (1, out_channels, in_channels, 1), jnp.float32)
    fc_w = jax.random.normal(k_fc, (in_channels, style_size), jnp.float32)
    x = jax.random.normal(k_x, (B, img_size, in_channels), jnp.float32)
    style = jax.random.normal(k_s, (B, style_size), jnp.float32)

    # 1) f32 matmul path; l_tile=128 so the img_size tiling is actually
    #    exercised (grid covers 2 L tiles). Strict check against the reference.
    out_f32 = modulated_linear(x, style, w0, fc_w, demodulation=True,
                               matmul_dtype=jnp.float32, l_tile=128)
    out_f32 = jax.block_until_ready(out_f32)
    ref_f32 = _torch_semantics_ref(x, style, w0, fc_w, demodulation=True)
    assert out_f32.shape == (B, img_size, out_channels), out_f32.shape
    np.testing.assert_allclose(np.asarray(out_f32), np.asarray(ref_f32),
                               rtol=1e-5, atol=1e-5)

    # 2) bf16 matmul + bf16 output path (recommended): x streams in f32 and is
    #    cast in-kernel; modulation/demod and accumulation stay f32; output HBM
    #    bytes are halved. Auto (budget-derived) tiling.
    out_bf16 = modulated_linear(x, style, w0, fc_w, demodulation=True,
                                matmul_dtype=jnp.bfloat16,
                                out_dtype=jnp.bfloat16)
    out_bf16 = jax.block_until_ready(out_bf16)
    ref_bf16 = _torch_semantics_ref(x, style, w0, fc_w, demodulation=True,
                                    matmul_dtype=jnp.bfloat16)
    np.testing.assert_allclose(np.asarray(out_bf16.astype(jnp.float32)),
                               np.asarray(ref_bf16), rtol=1e-2, atol=1e-2)

    # 3) B=1 path: exercises the (L_outer "parallel", L_inner "arbitrary")
    #    split used for v7x megacore utilization with tiny batch.
    out_b1 = modulated_linear(x[:1], style[:1], w0, fc_w, demodulation=True,
                              matmul_dtype=jnp.float32, l_tile=128)
    out_b1 = jax.block_until_ready(out_b1)
    ref_b1 = _torch_semantics_ref(x[:1], style[:1], w0, fc_w, demodulation=True)
    np.testing.assert_allclose(np.asarray(out_b1), np.asarray(ref_b1),
                               rtol=1e-5, atol=1e-5)

    print("KERNEL_OK")
</pallas_src>

<mosaic_0001>
module attributes {stable_mosaic.version = 11 : i64} {
  func.func @_modulated_linear_kernel(%arg0: i32, %arg1: i32, %arg2: i32, %arg3: memref<1x1x8xf32, #tpu.memory_space<vmem>>, %arg4: memref<16x8xf32, #tpu.memory_space<vmem>>, %arg5: memref<1x8x128xf32, #tpu.memory_space<vmem>>, %arg6: memref<1x16x128xf32, #tpu.memory_space<vmem>>, %arg7: memref<16x8xf32, #tpu.memory_space<vmem>>) attributes {dimension_semantics = [#tpu.dimension_semantics<parallel>, #tpu.dimension_semantics<parallel>, #tpu.dimension_semantics<arbitrary>], iteration_bounds = array<i64: 2, 1, 2>, scalar_prefetch = 0 : i64, scratch_operands = 1 : i64, tpu.core_type = #tpu.core_type<tc>, window_params = [{transform_indices = @transform_0, window_bounds = array<i64: 1, 1, 8>}, {pipeline_mode = #tpu.pipeline_mode<synchronous>, transform_indices = @transform_1, window_bounds = array<i64: 16, 8>}, {transform_indices = @transform_2, window_bounds = array<i64: 1, 8, 128>}, {transform_indices = @transform_3, window_bounds = array<i64: 1, 16, 128>}]} {
    %c0_i32 = arith.constant 0 : i32
    %0 = arith.cmpi eq, %arg2, %c0_i32 : i32
    %1 = arith.extui %0 : i1 to i32
    %c0_i32_0 = arith.constant 0 : i32
    %2 = arith.cmpi ne, %1, %c0_i32_0 : i32
    scf.if %2 {
      %c0_8 = arith.constant 0 : index
      %c0_9 = arith.constant 0 : index
      %10 = vector.load %arg4[%c0_8, %c0_9] : memref<16x8xf32, #tpu.memory_space<vmem>>, vector<16x8xf32>
      %c0_10 = arith.constant 0 : index
      %c0_11 = arith.constant 0 : index
      %c0_12 = arith.constant 0 : index
      %11 = vector.load %arg3[%c0_10, %c0_11, %c0_12] : memref<1x1x8xf32, #tpu.memory_space<vmem>>, vector<1x1x8xf32>
      %12 = vector.shape_cast %11 : vector<1x1x8xf32> to vector<1x8xf32>
      %13 = vector.broadcast %12 : vector<1x8xf32> to vector<16x8xf32>
      %14 = arith.mulf %10, %13 : vector<16x8xf32>
      %15 = arith.mulf %14, %14 : vector<16x8xf32>
      %cst_13 = arith.constant dense<0.000000e+00> : vector<16xf32>
      %16 = vector.multi_reduction <add>, %15, %cst_13 [1] : vector<16x8xf32> to vector<16xf32>
      %17 = vector.shape_cast %16 : vector<16xf32> to vector<16x1xf32>
      %cst_14 = arith.constant 9.99999993E-9 : f32
      %18 = vector.broadcast %cst_14 : f32 to vector<16x1xf32>
      %19 = arith.addf %17, %18 : vector<16x1xf32>
      %20 = math.rsqrt %19 : vector<16x1xf32>
      %21 = vector.broadcast %20 : vector<16x1xf32> to vector<16x8xf32>
      %22 = arith.mulf %14, %21 : vector<16x8xf32>
      %c0_15 = arith.constant 0 : index
      %c0_16 = arith.constant 0 : index
      %23 = vector.load %arg7[%c0_15, %c0_16] : memref<16x8xf32, #tpu.memory_space<vmem>>, vector<16x8xf32>
      tpu.vector_store %arg7[%c0_15, %c0_16], %22 {strides = array<i32>} : memref<16x8xf32, #tpu.memory_space<vmem>>, vector<16x8xf32>,
    } else {
    }
    %c0 = arith.constant 0 : index
    %c0_1 = arith.constant 0 : index
    %c0_2 = arith.constant 0 : index
    %3 = vector.load %arg5[%c0, %c0_1, %c0_2] : memref<1x8x128xf32, #tpu.memory_space<vmem>>, vector<1x8x128xf32>
    %4 = vector.shape_cast %3 : vector<1x8x128xf32> to vector<8x128xf32>
    %c0_3 = arith.constant 0 : index
    %c0_4 = arith.constant 0 : index
    %5 = vector.load %arg7[%c0_3, %c0_4] : memref<16x8xf32, #tpu.memory_space<vmem>>, vector<16x8xf32>
    %cst = arith.constant dense<0.000000e+00> : vector<16x128xf32>
    %6 = tpu.matmul %5, %4, %cst {dimension_numbers = #tpu.dot_dimension_numbers<[1], [0], [0], [1], [0, 0, 1, 1], [], []>} : vector<16x8xf32>, vector<8x128xf32>, vector<16x128xf32> -> vector<16x128xf32>
    %c0_5 = arith.constant 0 : index
    %c0_6 = arith.constant 0 : index
    %c0_7 = arith.constant 0 : index
    %7 = vector.load %arg6[%c0_5, %c0_6, %c0_7] : memref<1x16x128xf32, #tpu.memory_space<vmem>>, vector<1x16x128xf32>
    %8 = vector.shape_cast %7 : vector<1x16x128xf32> to vector<16x128xf32>
    %9 = vector.shape_cast %6 : vector<16x128xf32> to vector<1x16x128xf32>
    tpu.vector_store %arg6[%c0_5, %c0_6, %c0_7], %9 {strides = array<i32>} : memref<1x16x128xf32, #tpu.memory_space<vmem>>, vector<1x16x128xf32>,
    return
  }
  func.func @transform_0(%arg0: i32, %arg1: i32, %arg2: i32) -> (i32, i32, i32) {
    %c0_i32 = arith.constant 0 : i32
    %c0_i32_0 = arith.constant 0 : i32
    %c0_i32_1 = arith.constant 0 : i32
    return %arg0, %c0_i32, %c0_i32_0 : i32, i32, i32
  }
  func.func @transform_1(%arg0: i32, %arg1: i32, %arg2: i32) -> (i32, i32) {
    %c0_i32 = arith.constant 0 : i32
    %c0_i32_0 = arith.constant 0 : i32
    %c0_i32_1 = arith.constant 0 : i32
    return %c0_i32, %c0_i32_0 : i32, i32
  }
  func.func @transform_2(%arg0: i32, %arg1: i32, %arg2: i32) -> (i32, i32, i32) {
    %c2_i32 = arith.constant 2 : i32
    %0 = arith.muli %arg1, %c2_i32 : i32
    %1 = arith.addi %0, %arg2 : i32
    %c0_i32 = arith.constant 0 : i32
    %c0_i32_0 = arith.constant 0 : i32
    return %arg0, %c0_i32, %1 : i32, i32, i32
  }
  func.func @transform_3(%arg0: i32, %arg1: i32, %arg2: i32) -> (i32, i32, i32) {
    %c2_i32 = arith.constant 2 : i32
    %0 = arith.muli %arg1, %c2_i32 : i32
    %1 = arith.addi %0, %arg2 : i32
    %c0_i32 = arith.constant 0 : i32
    %c0_i32_0 = arith.constant 0 : i32
    return %arg0, %c0_i32, %1 : i32, i32, i32
  }
}

module attributes {stable_mosaic.version = 11 : i64} {
  func.func @_modulated_linear_kernel(%arg0: i32, %arg1: i32, %arg2: i32, %arg3: memref<1x1x8xf32, #tpu.memory_space<vmem>>, %arg4: memref<16x8xf32, #tpu.memory_space<vmem>>, %arg5: memref<1x8x128xf32, #tpu.memory_space<vmem>>, %arg6: memref<1x16x128xf32, #tpu.memory_space<vmem>>, %arg7: memref<16x8xf32, #tpu.memory_space<vmem>>) attributes {dimension_semantics = [#tpu.dimension_semantics<parallel>, #tpu.dimension_semantics<parallel>, #tpu.dimension_semantics<arbitrary>], iteration_bounds = array<i64: 2, 1, 2>, scalar_prefetch = 0 : i64, scratch_operands = 1 : i64, tpu.core_type = #tpu.core_type<tc>, window_params = [{transform_indices = @transform_0, window_bounds = array<i64: 1, 1, 8>}, {pipeline_mode = #tpu.pipeline_mode<synchronous>, transform_indices = @transform_1, window_bounds = array<i64: 16, 8>}, {transform_indices = @transform_2, window_bounds = array<i64: 1, 8, 128>}, {transform_indices = @transform_3, window_bounds = array<i64: 1, 16, 128>}]} {
    %c0_i32 = arith.constant 0 : i32
    %0 = arith.cmpi eq, %arg2, %c0_i32 : i32
    %1 = arith.extui %0 : i1 to i32
    %c0_i32_0 = arith.constant 0 : i32
    %2 = arith.cmpi ne, %1, %c0_i32_0 : i32
    scf.if %2 {
      %c0_8 = arith.constant 0 : index
      %c0_9 = arith.constant 0 : index
      %10 = vector.load %arg4[%c0_8, %c0_9] : memref<16x8xf32, #tpu.memory_space<vmem>>, vector<16x8xf32>
      %c0_10 = arith.constant 0 : index
      %c0_11 = arith.constant 0 : index
      %c0_12 = arith.constant 0 : index
      %11 = vector.load %arg3[%c0_10, %c0_11, %c0_12] : memref<1x1x8xf32, #tpu.memory_space<vmem>>, vector<1x1x8xf32>
      %12 = vector.shape_cast %11 : vector<1x1x8xf32> to vector<1x8xf32>
      %13 = vector.broadcast %12 : vector<1x8xf32> to vector<16x8xf32>
      %14 = arith.mulf %10, %13 : vector<16x8xf32>
      %15 = arith.mulf %14, %14 : vector<16x8xf32>
      %cst_13 = arith.constant dense<0.000000e+00> : vector<16xf32>
      %16 = vector.multi_reduction <add>, %15, %cst_13 [1] : vector<16x8xf32> to vector<16xf32>
      %17 = vector.shape_cast %16 : vector<16xf32> to vector<16x1xf32>
      %cst_14 = arith.constant 9.99999993E-9 : f32
      %18 = vector.broadcast %cst_14 : f32 to vector<16x1xf32>
      %19 = arith.addf %17, %18 : vector<16x1xf32>
      %20 = math.rsqrt %19 : vector<16x1xf32>
      %21 = vector.broadcast %20 : vector<16x1xf32> to vector<16x8xf32>
      %22 = arith.mulf %14, %21 : vector<16x8xf32>
      %c0_15 = arith.constant 0 : index
      %c0_16 = arith.constant 0 : index
      %23 = vector.load %arg7[%c0_15, %c0_16] : memref<16x8xf32, #tpu.memory_space<vmem>>, vector<16x8xf32>
      tpu.vector_store %arg7[%c0_15, %c0_16], %22 {strides = array<i32>} : memref<16x8xf32, #tpu.memory_space<vmem>>, vector<16x8xf32>,
    } else {
    }
    %c0 = arith.constant 0 : index
    %c0_1 = arith.constant 0 : index
    %c0_2 = arith.constant 0 : index
    %3 = vector.load %arg5[%c0, %c0_1, %c0_2] : memref<1x8x128xf32, #tpu.memory_space<vmem>>, vector<1x8x128xf32>
    %4 = vector.shape_cast %3 : vector<1x8x128xf32> to vector<8x128xf32>
    %c0_3 = arith.constant 0 : index
    %c0_4 = arith.constant 0 : index
    %5 = vector.load %arg7[%c0_3, %c0_4] : memref<16x8xf32, #tpu.memory_space<vmem>>, vector<16x8xf32>
    %cst = arith.constant dense<0.000000e+00> : vector<16x128xf32>
    %6 = tpu.matmul %5, %4, %cst {dimension_numbers = #tpu.dot_dimension_numbers<[1], [0], [0], [1], [0, 0, 1, 1], [], []>} : vector<16x8xf32>, vector<8x128xf32>, vector<16x128xf32> -> vector<16x128xf32>
    %c0_5 = arith.constant 0 : index
    %c0_6 = arith.constant 0 : index
    %c0_7 = arith.constant 0 : index
    %7 = vector.load %arg6[%c0_5, %c0_6, %c0_7] : memref<1x16x128xf32, #tpu.memory_space<vmem>>, vector<1x16x128xf32>
    %8 = vector.shape_cast %7 : vector<1x16x128xf32> to vector<16x128xf32>
    %9 = vector.shape_cast %6 : vector<16x128xf32> to vector<1x16x128xf32>
    tpu.vector_store %arg6[%c0_5, %c0_6, %c0_7], %9 {strides = array<i32>} : memref<1x16x128xf32, #tpu.memory_space<vmem>>, vector<1x16x128xf32>,
    return
  }
  func.func @transform_0(%arg0: i32, %arg1: i32, %arg2: i32) -> (i32, i32, i32) {
    %c0_i32 = arith.constant 0 : i32
    %c0_i32_0 = arith.constant 0 : i32
    %c0_i32_1 = arith.constant 0 : i32
    return %arg0, %c0_i32, %c0_i32_0 : i32, i32, i32
  }
  func.func @transform_1(%arg0: i32, %arg1: i32, %arg2: i32) -> (i32, i32) {
    %c0_i32 = arith.constant 0 : i32
    %c0_i32_0 = arith.constant 0 : i32
    %c0_i32_1 = arith.constant 0 : i32
    return %c0_i32, %c0_i32_0 : i32, i32
  }
  func.func @transform_2(%arg0: i32, %arg1: i32, %arg2: i32) -> (i32, i32, i32) {
    %c2_i32 = arith.constant 2 : i32
    %0 = arith.muli %arg1, %c2_i32 : i32
    %1 = arith.addi %0, %arg2 : i32
    %c0_i32 = arith.constant 0 : i32
    %c0_i32_0 = arith.constant 0 : i32
    return %arg0, %c0_i32, %1 : i32, i32, i32
  }
  func.func @transform_3(%arg0: i32, %arg1: i32, %arg2: i32) -> (i32, i32, i32) {
    %c2_i32 = arith.constant 2 : i32
    %0 = arith.muli %arg1, %c2_i32 : i32
    %1 = arith.addi %0, %arg2 : i32
    %c0_i32 = arith.constant 0 : i32
    %c0_i32_0 = arith.constant 0 : i32
    return %arg0, %c0_i32, %1 : i32, i32, i32
  }
}

</mosaic_0001>

<bundles_post_ra>
// kernel: tpu_custom_call.1
= control target key start
LH: loop header
LB: loop body
LE: loop exit
PB: predicated region body
PF: predicated region fallthrough
CT: control target
= control target key end

     0   :  { %8 = vsyncpa [#allocation4], 0  ;;  %s967_s0 = inlined_call_operand.vmem [shape: f32[2,1,8], index: 0, kind: input, shape index: {}]   ;;  %s968_s1 = inlined_call_operand.vmem [shape: f32[16,8], index: 1, kind: input, shape index: {}]   ;;  %s969_s2 = inlined_call_operand.hbm [shape: f32[2,8,256], index: 2, kind: input, shape index: {}]   ;;  %s970_s3 = inlined_call_operand.hbm [shape: f32[2,16,256], index: 3, kind: output, shape index: {}]  }
   0x1   :  { %10 = vsyncpa [#allocation4 + $0x1], 0 }
   0x2   :  { %11 = vsyncpa [#allocation5], 0 }
   0x3   :  { %13 = vsyncpa [#allocation5 + $0x1], 0  ;;  %s746_s12 = smov 0   ;;  %s748_s13 = smov 0  }
   0x4   :  { %s750_s14 = smov 0   ;;  %s752_s15 = smov 0  }
   0x5   :  { %s754_s16 = smov 0   ;;  %s756_s17 = smov 0  }
   0x6   :  { %s758_s18 = smov 0   ;;  %s760_s19 = smov 0  }
   0x7 LB: > { %s479_s20 = sadd.s32 4294967295, %s719_s19   ;;  %s480_s21 = sadd.s32 4294967294, %s719_s19   ;;  %s719_s19 = sphi %s760_s19, %s19_s19   ;;  %s715_s18 = sphi %s758_s18, %s987_s18   ;;  %s711_s17 = sphi %s756_s17, %s986_s17   ;;  %s707_s16 = sphi %s754_s16, %s985_s16   ;;  %s703_s15 = sphi %s752_s15, %s984_s15   ;;  %s699_s14 = sphi %s750_s14, %s983_s14   ;;  %s695_s13 = sphi %s748_s13, %s982_s13   ;;  %s691_s12 = sphi %s746_s12, %s981_s12  }
   0x8   : > { %s31_s22 = sadd.s32 1, %s711_s17  ;;  %s38_s23 = sadd.s32 1, %s715_s18 }
   0x9   : > { %p32_p0 = scmp.ge.s32.totalorder %s31_s22, 2  ;;  %s98_s24 = sadd.s32 1, %s699_s14 }
   0xa   : > { %p105_p1 = scmp.ne.s32.totalorder %s699_s14, %s695_s13  ;;  %p106_p2 = scmp.eq.s32.totalorder %s719_s19, 0 }
   0xb   : > { %s989_s22 = smov (%p32_p0, %s31_s22), 0  ;;  %s991_s23 = smov (!%p32_p0, %s38_s23), %s715_s18 }
   0xc   : > { %s94_s25 = ssub.s32 %s711_s17, %s989_s22  ;;  %p799_p3 = por %p106_p2, %p105_p1 }
   0xd   : > { %p40_p4 = scmp.ge.s32.totalorder %s991_s23, 2  ;;  %p111_p5 = scmp.ne.s32.totalorder %s695_s13, %s691_s12 }
   0xe   : > { %p112_p6 = scmp.eq.s32.totalorder %s479_s20, 0  ;;  %p141_p7 = scmp.eq.s32.totalorder %s479_s20, 3 }
   0xf   : > { %s993_s23 = smov (%p40_p4, %s991_s23), 0  ;;  %p147_p10 = scmp.eq.s32.totalorder %s480_s21, 3 }
  0x10   : > { %p807_p8 = por %p112_p6, %p111_p5  ;;  %p811_p9 = por %p141_p7, %p105_p1 }
  0x11   : > { %s93_s29 = ssub.s32 %s715_s18, %s993_s23  ;;  %p817_p12 = por %p147_p10, %p111_p5 }
  0x12   : > { %s974_s28 = scalar_select %p811_p9, 1, 0 }
  0x13   : > { %s95_s30 = sor.u32 %s94_s25, %s93_s29  ;;  %p518_p13 = scmp.lt.s32.totalorder %s719_s19, 4 }
  0x14   : > { %p96_p11 = scmp.eq.s32.totalorder %s95_s30, 0  ;;  %s176_s5 = sand.u32 1, %s699_s14  }
  0x15   : > { %s975_s4 = scalar_select %p817_p12, 1, 0 }
  0x16   : > { %s824_s6 = scalar_select %p96_p11, %s699_s14, %s98_s24  }
  0x17   : > { %s483_s7 = sshll.u32 %s176_s5, 3  ;;  %s484_s8 = sshll.u32 %s715_s18, 1 }
  0x18   : > { %s187_s9 = sadd.s32 %s711_s17, %s484_s8  ;;  %s180_s10 = scalar_lea.vmem [#allocation3], %s483_s7 }
  0x19   : > { %s191_s11 = sshll.u32 %s180_s10, 4  ;;  %s485_s20 = sshll.u32 %s187_s9, 7  ;;  %s828_s11 = int_to_ptr.vmem [resolvable:$true] %s191_s11 }
  0x1a   : > { %s833_s29 = scalar_lea.hbm %s969_s2, %s485_s20  ;;  %p837_p0 = pnand %p518_p13, %p799_p3 }
  0x1b   : > { %s177_s30 = scalar_lea.sflag [#allocation4], %s176_s5  ;;  %s591_s7 = scalar_lea.hbm %s833_s29, 128 }
  0x1c   : > { %p592_p4 = scmp.ne.s32.totalorder %s833_s29, %s591_s7  ;;  %p593_p5 = pneg %p837_p0 }
  0x1d   : > { %s596_s9 = scalar_lea.hbm %s969_s2, 512  ;;  %p597_p3 = scmp.lt.u32.totalorder %s833_s29, %s969_s2 }
  0x1e   : > { %p594_p6 = pnand %p593_p5, %p592_p4  ;;  %p598_p10 = scmp.lt.u32.totalorder %s596_s9, %s591_s7 }
  0x1f   : > { %p600_p13 = scmp.lt.u32.totalorder %s591_s7, %s833_s29 }
  0x20   : > { %p595_p7 = pneg %p594_p6  ;;  %p599_p11 = por %p598_p10, %p597_p3 }
  0x22   : > { %p601_p1 = por %p600_p13, %p599_p11 }
  0x24   : > { %p602_p2 = pnand %p601_p1, %p595_p7 }
  0x26   : > { %605 = shalt.err (!%p602_p2)
}
  0x27   : > { %s606_s5 = scalar_lea.vmem %s828_s11, 128  ;;  %s721_s21 = smov [#allocation3]  }
  0x28   : > { %p607_p4 = scmp.ne.s32.totalorder %s828_s11, %s606_s5  ;;  %s611_s25 = sshll.u32 %s721_s21, 4  ;;  %s612_s25 = int_to_ptr.vmem [resolvable:$false] %s611_s25 }
  0x29   : > { %s613_s26 = scalar_lea.vmem %s612_s25, 256  ;;  %p614_p9 = scmp.lt.s32.totalorder %s828_s11, %s612_s25 }
  0x2a   : > { %p609_p6 = pnand %p607_p4, %p593_p5  ;;  %p615_p3 = scmp.lt.s32.totalorder %s613_s26, %s606_s5 }
  0x2c   : > { %p610_p12 = pneg %p609_p6  ;;  %p616_p10 = por %p615_p3, %p614_p9 }
  0x2e   : > { %p617_p11 = pnand %p616_p10, %p610_p12 }
  0x30   : > { %620 = shalt.err (!%p617_p11)
}
  0x31   : > { %513 = dma.hbm_to_vmem [thread:$0]  (!%p837_p0), %s833_s29, 128, %s828_s11, %s177_s30  }
  0x32   : > { %p977_p1 = scmp.lt.s32.totalorder %s719_s19, 5  ;;  %p978_p2 = scmp.ge.s32.totalorder %s719_s19, 1 }
  0x34   : > { %p197_p5 = pnand %p978_p2, %p977_p1 }
  0x35   : > { %s873_s7 = sand.u32 (!%p197_p5), 1, %s695_s13  }
  0x36   : > { %200 = sbr.rel (%p197_p5) target bundleno = 471 (0x1d7), region = 32  ;;  %s487_s8 = sshll.u32 (!%p197_p5), %s873_s7, 3 }
  0x37   : > { %s203_s9 = scalar_lea.sflag (!%p197_p5), [#allocation4], %s873_s7  ;;  %s877_s10 = scalar_lea.vmem (!%p197_p5), [#allocation3], %s487_s8 }
  0x3d   : > { %682 = dma.done.wait (%p807_p8), %s203_s9, 128  }
  0x3e   : > { %684 = vsyncadd (%p807_p8), %s203_s9, 4294967168  ;;  %s488_s11 = sshll.u32 %s873_s7, 4  ;;  %p232_p9 = scmp.lt.s32.totalorder %s707_s16, 1 }
  0x3f   : > { %s889_s5 = scalar_lea.vmem [#allocation6], %s488_s11  ;;  %p489_p12 = scmp.ne.s32.totalorder %s703_s15, 0 }
  0x40   : > { %s233_s29 = scalar_select %p232_p9, %s707_s16, 1 }
  0x41   : > { %242 = sbr.rel (%p489_p12) target bundleno = 235 (0xeb), region = 40  ;;  %v243_v0 = vld [vmem:[%s968_s1] sm:$0xff] (!%p489_p12)  ;;  %v244_v2 = vld [vmem:[%s968_s1 + $0x8] sm:$0xff] (!%p489_p12)  ;;  %vm256_vm0 = vcmask (!%p489_p12), 64512  }
  0x42   : > { %s234_s20 = scalar_lea.vmem %s967_s0, %s233_s29 }
  0x43   : > { %v490_v1 = vld [vmem:[%s234_s20] ss:$0 sm:$0xff] (!%p489_p12) }
  0x44   : > { %v252_v3 = vmul.f32 (!%p489_p12), %v490_v1, %v243_v0  ;;  %v253_v4 = vmul.f32 (!%p489_p12), %v490_v1, %v244_v2 }
  0x46   : > { %v254_v5 = vmul.f32 (!%p489_p12), %v252_v3, %v252_v3  ;;  %v255_v6 = vmul.f32 (!%p489_p12), %v253_v4, %v253_v4 }
  0x48   : > { %v257_v7 = vsel %vm256_vm0, %v254_v5, 0.0  ;;  %v260_v8 = vsel %vm256_vm0, %v255_v6, 0.0 }
  0x49   : > { %258 = vadd.xlane.f32.xlu0 %v257_v7 }
  0x4d   : > { %261 = vadd.xlane.f32.xlu0 %v260_v8 }
  0xd6   : > { %v259_v9 = vpop.xlane.xlu0 %258 }
  0xd7   : > { %v263_v10 = vadd.f32 1e-08, %v259_v9 }
  0xd9   : > { %587 = vrsqrt.f32 %v263_v10 }
  0xda   : > { %v262_v11 = vpop.xlane.xlu0 %261 }
  0xdb   : > { %v264_v12 = vadd.f32 1e-08, %v262_v11 }
  0xdd   : > { %589 = vrsqrt.f32 %v264_v12 }
  0xe3   : > { %v588_v13 = vpop.eup %587 }
  0xe4   : > { %v267_v14 = vmul.f32 %v588_v13, %v252_v3 }
  0xe6   : > { %269 = vst.msk [vmem:[#allocation2] sm:$0xff] %vm256_vm0, %v267_v14 }
  0xe7   : > { %v590_v15 = vpop.eup %589 }
  0xe8   : > { %v268_v16 = vmul.f32 %v590_v15, %v253_v4 }
  0xea   : > { %270 = vst.msk [vmem:[#allocation2 + $0x8] sm:$0xff] %vm256_vm0, %v268_v16 }
  0xeb PF: > { %v271_v17 = vld [vmem:[%s877_s10] sm:$0xff]  ;;  %vm274_vm1 = vcmask 64512   ;;  %s494_s8 = sshll.u32 %s707_s16, 2  ;;  %s375_s29 = sshll.u32 %s889_s5, 4  ;;  %s911_s29 = int_to_ptr.vmem [resolvable:$true] %s375_s29 }
  0xec   : > { %501 = vmatprep.subr.mxu0 %v271_v17  ;;  %s372_s9 = sadd.s32 %s703_s15, %s494_s8  ;;  %s359_s10 = scalar_lea.sflag [#allocation5], %s873_s7 }
  0xed   : > { %v272_v18 = vld [vmem:[#allocation2] sm:$0xff]  ;;  %502 = vmatpush3.msra.mxu0 %v271_v17  ;;  %s495_s11 = sshll.u32 %s372_s9, 7  ;;  %s621_s21 = scalar_lea.vmem %s911_s29, 256 }
  0xee   : > { %503 = vmatprep.mubr.msk.f32.mxu0 %vm274_vm1, %v272_v18  ;;  %s909_s20 = scalar_lea.hbm %s970_s3, %s495_s11  ;;  %p622_p8 = scmp.ne.s32.totalorder %s911_s29, %s621_s21 }
  0xef   : > { %p979_p0 = scmp.ne.s32.totalorder %s974_s28, 0  ;;  %s722_s15 = smov [#allocation6]  }
  0xf0   : > { %s625_s16 = sshll.u32 %s722_s15, 4  ;;  %s626_s16 = int_to_ptr.vmem [resolvable:$false] %s625_s16 }
  0xf1   : > { %v273_v19 = vld [vmem:[#allocation2 + $0x8] sm:$0xff]  ;;  %p623_p7 = pnand %p622_p8, %p979_p0  ;;  %s627_s25 = scalar_lea.vmem %s626_s16, 512 }
  0xf2   : > { %504 = vmatmul.mubr.msk.f32.vlgmr.msra.gmra.mrb[0].mxu0 %vm274_vm1, %v273_v19  ;;  %p628_p4 = scmp.lt.s32.totalorder %s911_s29, %s626_s16  ;;  %p629_p6 = scmp.lt.s32.totalorder %s627_s25, %s621_s21 }
  0xf3   : > { %p624_p13 = pneg %p623_p7 }
  0xf4   : > { %p630_p3 = por %p629_p6, %p628_p4 }
  0xf6   : > { %p631_p10 = pnand %p630_p3, %p624_p13 }
 0x1c5   : > { %v505_v20 = vpop.f32.mrb[0].mxu0 }
 0x1c6   : > { %357 = vst [vmem:[%s889_s5 + $0x8] sm:$0xff] %v505_v20  ;;  %v347_v21 = vpop.f32.mrb[1].mxu0 }
 0x1c7   : > { %356 = vst [vmem:[%s889_s5] sm:$0xff] %v347_v21 }
 0x1c8   : > { %634 = shalt.err (!%p631_p10)
}
 0x1c9   : > { %s635_s5 = scalar_lea.hbm %s909_s20, 256  ;;  %s639_s8 = scalar_lea.hbm %s970_s3, 1024 }
 0x1ca   : > { %p636_p11 = scmp.ne.s32.totalorder %s909_s20, %s635_s5  ;;  %p640_p5 = scmp.lt.u32.totalorder %s909_s20, %s970_s3 }
 0x1cb   : > { %p641_p9 = scmp.lt.u32.totalorder %s639_s8, %s635_s5  ;;  %p643_p8 = scmp.lt.u32.totalorder %s635_s5, %s909_s20 }
 0x1cc   : > { %p637_p1 = pnand %p636_p11, %p979_p0 }
 0x1cd   : > { %p642_p12 = por %p641_p9, %p640_p5 }
 0x1ce   : > { %p638_p2 = pneg %p637_p1 }
 0x1cf   : > { %p644_p7 = por %p643_p8, %p642_p12 }
 0x1d1   : > { %p645_p13 = pnand %p644_p7, %p638_p2 }
 0x1d3   : > { %648 = shalt.err (!%p645_p13)
}
 0x1d4   : > { %s723_s24 = smov 128   ;;  %s724_s30 = smov 256  }
 0x1d5   : > { %s725_s21 = smov 8  }
 0x1d6   : > { %508 = dma.vmem_to_hbm [thread:$0]  (%p979_p0), %s911_s29, 256, %s909_s20, %s359_s10, %s723_s24, %s724_s30, %s725_s21  }
 0x1d7 PF: > { %p519_p4 = scmp.ge.s32.totalorder %s719_s19, 2  ;;  %s390_s15 = sand.u32 1, %s691_s12  }
 0x1d8   : > { %p980_p6 = scmp.ne.s32.totalorder %s975_s4, 0  ;;  %s391_s16 = scalar_lea.sflag [#allocation5], %s390_s15 }
 0x1da   : > { %p515_p3 = pnand %p519_p4, %p980_p6 }
 0x1dc   : > { %686 = dma.done.wait (!%p515_p3), %s391_s16, 256  }
 0x1dd   : > { %688 = vsyncadd (!%p515_p3), %s391_s16, 4294967040  ;;  %s19_s19 = sadd.s32 1, %s719_s19   ;;  %s981_s12 = smov %s695_s13 }
 0x1de   : > { %p16_p10 = scmp.ge.s32.totalorder %s19_s19, 6   ;;  %s982_s13 = smov %s699_s14 }
 0x1df   : > { %s983_s14 = smov %s824_s6  ;;  %s984_s15 = smov %s711_s17 }
 0x1e0   : > { %s985_s16 = smov %s715_s18  ;;  %s986_s17 = smov %s989_s22 }
 0x1e1   : > { %s987_s18 = smov %s993_s23  ;;  %18 = sbr.rel (!%p16_p10) target bundleno = 7 (0x7), region = 84 }
 0x1e8   :  { %396 = vsyncpa [#allocation4], 1 }
 0x1e9   :  { %398 = vsyncpa [#allocation4 + $0x1], 1 }
 0x1ea   :  { %399 = vsyncpa [#allocation5], 1 }
 0x1eb   :  { %401 = vsyncpa [#allocation5 + $0x1], 1 }

// kernel: tpu_custom_call.1
= control target key start
LH: loop header
LB: loop body
LE: loop exit
PB: predicated region body
PF: predicated region fallthrough
CT: control target
= control target key end

     0   :  { %8 = vsyncpa [#allocation4], 0  ;;  %s967_s0 = inlined_call_operand.vmem [shape: f32[2,1,8], index: 0, kind: input, shape index: {}]   ;;  %s968_s1 = inlined_call_operand.vmem [shape: f32[16,8], index: 1, kind: input, shape index: {}]   ;;  %s969_s2 = inlined_call_operand.hbm [shape: f32[2,8,256], index: 2, kind: input, shape index: {}]   ;;  %s970_s3 = inlined_call_operand.hbm [shape: f32[2,16,256], index: 3, kind: output, shape index: {}]  }
   0x1   :  { %10 = vsyncpa [#allocation4 + $0x1], 0 }
   0x2   :  { %11 = vsyncpa [#allocation5], 0 }
   0x3   :  { %13 = vsyncpa [#allocation5 + $0x1], 0  ;;  %s746_s12 = smov 0   ;;  %s748_s13 = smov 0  }
   0x4   :  { %s750_s14 = smov 0   ;;  %s752_s15 = smov 0  }
   0x5   :  { %s754_s16 = smov 0   ;;  %s756_s17 = smov 0  }
   0x6   :  { %s758_s18 = smov 0   ;;  %s760_s19 = smov 0  }
   0x7 LB: > { %s479_s20 = sadd.s32 4294967295, %s719_s19   ;;  %s480_s21 = sadd.s32 4294967294, %s719_s19   ;;  %s719_s19 = sphi %s760_s19, %s19_s19   ;;  %s715_s18 = sphi %s758_s18, %s987_s18   ;;  %s711_s17 = sphi %s756_s17, %s986_s17   ;;  %s707_s16 = sphi %s754_s16, %s985_s16   ;;  %s703_s15 = sphi %s752_s15, %s984_s15   ;;  %s699_s14 = sphi %s750_s14, %s983_s14   ;;  %s695_s13 = sphi %s748_s13, %s982_s13   ;;  %s691_s12 = sphi %s746_s12, %s981_s12  }
   0x8   : > { %s31_s22 = sadd.s32 1, %s711_s17  ;;  %s38_s23 = sadd.s32 1, %s715_s18 }
   0x9   : > { %p32_p0 = scmp.ge.s32.totalorder %s31_s22, 2  ;;  %s98_s24 = sadd.s32 1, %s699_s14 }
   0xa   : > { %p105_p1 = scmp.ne.s32.totalorder %s699_s14, %s695_s13  ;;  %p106_p2 = scmp.eq.s32.totalorder %s719_s19, 0 }
   0xb   : > { %s989_s22 = smov (%p32_p0, %s31_s22), 0  ;;  %s991_s23 = smov (!%p32_p0, %s38_s23), %s715_s18 }
   0xc   : > { %s94_s25 = ssub.s32 %s711_s17, %s989_s22  ;;  %p799_p3 = por %p106_p2, %p105_p1 }
   0xd   : > { %p40_p4 = scmp.ge.s32.totalorder %s991_s23, 2  ;;  %p111_p5 = scmp.ne.s32.totalorder %s695_s13, %s691_s12 }
   0xe   : > { %p112_p6 = scmp.eq.s32.totalorder %s479_s20, 0  ;;  %p141_p7 = scmp.eq.s32.totalorder %s479_s20, 3 }
   0xf   : > { %s993_s23 = smov (%p40_p4, %s991_s23), 0  ;;  %p147_p10 = scmp.eq.s32.totalorder %s480_s21, 3 }
  0x10   : > { %p807_p8 = por %p112_p6, %p111_p5  ;;  %p811_p9 = por %p141_p7, %p105_p1 }
  0x11   : > { %s93_s29 = ssub.s32 %s715_s18, %s993_s23  ;;  %p817_p12 = por %p147_p10, %p111_p5 }
  0x12   : > { %s974_s28 = scalar_select %p811_p9, 1, 0 }
  0x13   : > { %s95_s30 = sor.u32 %s94_s25, %s93_s29  ;;  %p518_p13 = scmp.lt.s32.totalorder %s719_s19, 4 }
  0x14   : > { %p96_p11 = scmp.eq.s32.totalorder %s95_s30, 0  ;;  %s176_s5 = sand.u32 1, %s699_s14  }
  0x15   : > { %s975_s4 = scalar_select %p817_p12, 1, 0 }
  0x16   : > { %s824_s6 = scalar_select %p96_p11, %s699_s14, %s98_s24  }
  0x17   : > { %s483_s7 = sshll.u32 %s176_s5, 3  ;;  %s484_s8 = sshll.u32 %s715_s18, 1 }
  0x18   : > { %s187_s9 = sadd.s32 %s711_s17, %s484_s8  ;;  %s180_s10 = scalar_lea.vmem [#allocation3], %s483_s7 }
  0x19   : > { %s191_s11 = sshll.u32 %s180_s10, 4  ;;  %s485_s20 = sshll.u32 %s187_s9, 7  ;;  %s828_s11 = int_to_ptr.vmem [resolvable:$true] %s191_s11 }
  0x1a   : > { %s833_s29 = scalar_lea.hbm %s969_s2, %s485_s20  ;;  %p837_p0 = pnand %p518_p13, %p799_p3 }
  0x1b   : > { %s177_s30 = scalar_lea.sflag [#allocation4], %s176_s5  ;;  %s591_s7 = scalar_lea.hbm %s833_s29, 128 }
  0x1c   : > { %p592_p4 = scmp.ne.s32.totalorder %s833_s29, %s591_s7  ;;  %p593_p5 = pneg %p837_p0 }
  0x1d   : > { %s596_s9 = scalar_lea.hbm %s969_s2, 512  ;;  %p597_p3 = scmp.lt.u32.totalorder %s833_s29, %s969_s2 }
  0x1e   : > { %p594_p6 = pnand %p593_p5, %p592_p4  ;;  %p598_p10 = scmp.lt.u32.totalorder %s596_s9, %s591_s7 }
  0x1f   : > { %p600_p13 = scmp.lt.u32.totalorder %s591_s7, %s833_s29 }
  0x20   : > { %p595_p7 = pneg %p594_p6  ;;  %p599_p11 = por %p598_p10, %p597_p3 }
  0x22   : > { %p601_p1 = por %p600_p13, %p599_p11 }
  0x24   : > { %p602_p2 = pnand %p601_p1, %p595_p7 }
  0x26   : > { %605 = shalt.err (!%p602_p2)
}
  0x27   : > { %s606_s5 = scalar_lea.vmem %s828_s11, 128  ;;  %s721_s21 = smov [#allocation3]  }
  0x28   : > { %p607_p4 = scmp.ne.s32.totalorder %s828_s11, %s606_s5  ;;  %s611_s25 = sshll.u32 %s721_s21, 4  ;;  %s612_s25 = int_to_ptr.vmem [resolvable:$false] %s611_s25 }
  0x29   : > { %s613_s26 = scalar_lea.vmem %s612_s25, 256  ;;  %p614_p9 = scmp.lt.s32.totalorder %s828_s11, %s612_s25 }
  0x2a   : > { %p609_p6 = pnand %p607_p4, %p593_p5  ;;  %p615_p3 = scmp.lt.s32.totalorder %s613_s26, %s606_s5 }
  0x2c   : > { %p610_p12 = pneg %p609_p6  ;;  %p616_p10 = por %p615_p3, %p614_p9 }
  0x2e   : > { %p617_p11 = pnand %p616_p10, %p610_p12 }
  0x30   : > { %620 = shalt.err (!%p617_p11)
}
  0x31   : > { %513 = dma.hbm_to_vmem [thread:$0]  (!%p837_p0), %s833_s29, 128, %s828_s11, %s177_s30  }
  0x32   : > { %p977_p1 = scmp.lt.s32.totalorder %s719_s19, 5  ;;  %p978_p2 = scmp.ge.s32.totalorder %s719_s19, 1 }
  0x34   : > { %p197_p5 = pnand %p978_p2, %p977_p1 }
  0x35   : > { %s873_s7 = sand.u32 (!%p197_p5), 1, %s695_s13  }
  0x36   : > { %200 = sbr.rel (%p197_p5) target bundleno = 471 (0x1d7), region = 32  ;;  %s487_s8 = sshll.u32 (!%p197_p5), %s873_s7, 3 }
  0x37   : > { %s203_s9 = scalar_lea.sflag (!%p197_p5), [#allocation4], %s873_s7  ;;  %s877_s10 = scalar_lea.vmem (!%p197_p5), [#allocation3], %s487_s8 }
  0x3d   : > { %682 = dma.done.wait (%p807_p8), %s203_s9, 128  }
  0x3e   : > { %684 = vsyncadd (%p807_p8), %s203_s9, 4294967168  ;;  %s488_s11 = sshll.u32 %s873_s7, 4  ;;  %p232_p9 = scmp.lt.s32.totalorder %s707_s16, 1 }
  0x3f   : > { %s889_s5 = scalar_lea.vmem [#allocation6], %s488_s11  ;;  %p489_p12 = scmp.ne.s32.totalorder %s703_s15, 0 }
  0x40   : > { %s233_s29 = scalar_select %p232_p9, %s707_s16, 1 }
  0x41   : > { %242 = sbr.rel (%p489_p12) target bundleno = 235 (0xeb), region = 40  ;;  %v243_v0 = vld [vmem:[%s968_s1] sm:$0xff] (!%p489_p12)  ;;  %v244_v2 = vld [vmem:[%s968_s1 + $0x8] sm:$0xff] (!%p489_p12)  ;;  %vm256_vm0 = vcmask (!%p489_p12), 64512  }
  0x42   : > { %s234_s20 = scalar_lea.vmem %s967_s0, %s233_s29 }
  0x43   : > { %v490_v1 = vld [vmem:[%s234_s20] ss:$0 sm:$0xff] (!%p489_p12) }
  0x44   : > { %v252_v3 = vmul.f32 (!%p489_p12), %v490_v1, %v243_v0  ;;  %v253_v4 = vmul.f32 (!%p489_p12), %v490_v1, %v244_v2 }
  0x46   : > { %v254_v5 = vmul.f32 (!%p489_p12), %v252_v3, %v252_v3  ;;  %v255_v6 = vmul.f32 (!%p489_p12), %v253_v4, %v253_v4 }
  0x48   : > { %v257_v7 = vsel %vm256_vm0, %v254_v5, 0.0  ;;  %v260_v8 = vsel %vm256_vm0, %v255_v6, 0.0 }
  0x49   : > { %258 = vadd.xlane.f32.xlu0 %v257_v7 }
  0x4d   : > { %261 = vadd.xlane.f32.xlu0 %v260_v8 }
  0xd6   : > { %v259_v9 = vpop.xlane.xlu0 %258 }
  0xd7   : > { %v263_v10 = vadd.f32 1e-08, %v259_v9 }
  0xd9   : > { %587 = vrsqrt.f32 %v263_v10 }
  0xda   : > { %v262_v11 = vpop.xlane.xlu0 %261 }
  0xdb   : > { %v264_v12 = vadd.f32 1e-08, %v262_v11 }
  0xdd   : > { %589 = vrsqrt.f32 %v264_v12 }
  0xe3   : > { %v588_v13 = vpop.eup %587 }
  0xe4   : > { %v267_v14 = vmul.f32 %v588_v13, %v252_v3 }
  0xe6   : > { %269 = vst.msk [vmem:[#allocation2] sm:$0xff] %vm256_vm0, %v267_v14 }
  0xe7   : > { %v590_v15 = vpop.eup %589 }
  0xe8   : > { %v268_v16 = vmul.f32 %v590_v15, %v253_v4 }
  0xea   : > { %270 = vst.msk [vmem:[#allocation2 + $0x8] sm:$0xff] %vm256_vm0, %v268_v16 }
  0xeb PF: > { %v271_v17 = vld [vmem:[%s877_s10] sm:$0xff]  ;;  %vm274_vm1 = vcmask 64512   ;;  %s494_s8 = sshll.u32 %s707_s16, 2  ;;  %s375_s29 = sshll.u32 %s889_s5, 4  ;;  %s911_s29 = int_to_ptr.vmem [resolvable:$true] %s375_s29 }
  0xec   : > { %501 = vmatprep.subr.mxu0 %v271_v17  ;;  %s372_s9 = sadd.s32 %s703_s15, %s494_s8  ;;  %s359_s10 = scalar_lea.sflag [#allocation5], %s873_s7 }
  0xed   : > { %v272_v18 = vld [vmem:[#allocation2] sm:$0xff]  ;;  %502 = vmatpush3.msra.mxu0 %v271_v17  ;;  %s495_s11 = sshll.u32 %s372_s9, 7  ;;  %s621_s21 = scalar_lea.vmem %s911_s29, 256 }
  0xee   : > { %503 = vmatprep.mubr.msk.f32.mxu0 %vm274_vm1, %v272_v18  ;;  %s909_s20 = scalar_lea.hbm %s970_s3, %s495_s11  ;;  %p622_p8 = scmp.ne.s32.totalorder %s911_s29, %s621_s21 }
  0xef   : > { %p979_p0 = scmp.ne.s32.totalorder %s974_s28, 0  ;;  %s722_s15 = smov [#allocation6]  }
  0xf0   : > { %s625_s16 = sshll.u32 %s722_s15, 4  ;;  %s626_s16 = int_to_ptr.vmem [resolvable:$false] %s625_s16 }
  0xf1   : > { %v273_v19 = vld [vmem:[#allocation2 + $0x8] sm:$0xff]  ;;  %p623_p7 = pnand %p622_p8, %p979_p0  ;;  %s627_s25 = scalar_lea.vmem %s626_s16, 512 }
  0xf2   : > { %504 = vmatmul.mubr.msk.f32.vlgmr.msra.gmra.mrb[0].mxu0 %vm274_vm1, %v273_v19  ;;  %p628_p4 = scmp.lt.s32.totalorder %s911_s29, %s626_s16  ;;  %p629_p6 = scmp.lt.s32.totalorder %s627_s25, %s621_s21 }
  0xf3   : > { %p624_p13 = pneg %p623_p7 }
  0xf4   : > { %p630_p3 = por %p629_p6, %p628_p4 }
  0xf6   : > { %p631_p10 = pnand %p630_p3, %p624_p13 }
 0x1c5   : > { %v505_v20 = vpop.f32.mrb[0].mxu0 }
 0x1c6   : > { %357 = vst [vmem:[%s889_s5 + $0x8] sm:$0xff] %v505_v20  ;;  %v347_v21 = vpop.f32.mrb[1].mxu0 }
 0x1c7   : > { %356 = vst [vmem:[%s889_s5] sm:$0xff] %v347_v21 }
 0x1c8   : > { %634 = shalt.err (!%p631_p10)
}
 0x1c9   : > { %s635_s5 = scalar_lea.hbm %s909_s20, 256  ;;  %s639_s8 = scalar_lea.hbm %s970_s3, 1024 }
 0x1ca   : > { %p636_p11 = scmp.ne.s32.totalorder %s909_s20, %s635_s5  ;;  %p640_p5 = scmp.lt.u32.totalorder %s909_s20, %s970_s3 }
 0x1cb   : > { %p641_p9 = scmp.lt.u32.totalorder %s639_s8, %s635_s5  ;;  %p643_p8 = scmp.lt.u32.totalorder %s635_s5, %s909_s20 }
 0x1cc   : > { %p637_p1 = pnand %p636_p11, %p979_p0 }
 0x1cd   : > { %p642_p12 = por %p641_p9, %p640_p5 }
 0x1ce   : > { %p638_p2 = pneg %p637_p1 }
 0x1cf   : > { %p644_p7 = por %p643_p8, %p642_p12 }
 0x1d1   : > { %p645_p13 = pnand %p644_p7, %p638_p2 }
 0x1d3   : > { %648 = shalt.err (!%p645_p13)
}
 0x1d4   : > { %s723_s24 = smov 128   ;;  %s724_s30 = smov 256  }
 0x1d5   : > { %s725_s21 = smov 8  }
 0x1d6   : > { %508 = dma.vmem_to_hbm [thread:$0]  (%p979_p0), %s911_s29, 256, %s909_s20, %s359_s10, %s723_s24, %s724_s30, %s725_s21  }
 0x1d7 PF: > { %p519_p4 = scmp.ge.s32.totalorder %s719_s19, 2  ;;  %s390_s15 = sand.u32 1, %s691_s12  }
 0x1d8   : > { %p980_p6 = scmp.ne.s32.totalorder %s975_s4, 0  ;;  %s391_s16 = scalar_lea.sflag [#allocation5], %s390_s15 }
 0x1da   : > { %p515_p3 = pnand %p519_p4, %p980_p6 }
 0x1dc   : > { %686 = dma.done.wait (!%p515_p3), %s391_s16, 256  }
 0x1dd   : > { %688 = vsyncadd (!%p515_p3), %s391_s16, 4294967040  ;;  %s19_s19 = sadd.s32 1, %s719_s19   ;;  %s981_s12 = smov %s695_s13 }
 0x1de   : > { %p16_p10 = scmp.ge.s32.totalorder %s19_s19, 6   ;;  %s982_s13 = smov %s699_s14 }
 0x1df   : > { %s983_s14 = smov %s824_s6  ;;  %s984_s15 = smov %s711_s17 }
 0x1e0   : > { %s985_s16 = smov %s715_s18  ;;  %s986_s17 = smov %s989_s22 }
 0x1e1   : > { %s987_s18 = smov %s993_s23  ;;  %18 = sbr.rel (!%p16_p10) target bundleno = 7 (0x7), region = 84 }
 0x1e8   :  { %396 = vsyncpa [#allocation4], 1 }
 0x1e9   :  { %398 = vsyncpa [#allocation4 + $0x1], 1 }
 0x1ea   :  { %399 = vsyncpa [#allocation5], 1 }
 0x1eb   :  { %401 = vsyncpa [#allocation5 + $0x1], 1 }

</bundles_post_ra>
